<compile_context>
chip_gen: v7x
topology: tpu7x:2x2x1
jax: 0.10.0
libtpu: 0.0.40
codegen_flags: <defaults>
</compile_context>

<pallas_src>
import functools

import jax
import jax.numpy as jnp
from jax import lax
from jax.experimental import pallas as pl
from jax.experimental.pallas import tpu as pltpu

BN_EPS = 1e-5  # PyTorch BatchNorm1d default eps


# --------------------------------------------------------------------------- helpers
def _vmem_capacity_bytes():
    """Generation-aware VMEM capacity (falls back to the v7x per-core 64 MiB)."""
    try:
        cap = getattr(pltpu.get_tpu_info(), "vmem_capacity_bytes", None)
        if cap:
            return int(cap)
    except Exception:
        pass
    return 64 * 1024 * 1024


def _vmem_limit(est_bytes, cap):
    # Raise the scoped default but keep headroom on the smaller v7x VMEM.
    return int(min(max(2 * est_bytes, 32 * 1024 * 1024), int(cap * 0.75)))


# --------------------------------------------------------------------------- kernels
def _mlp_fused_kernel(x_ref, w1_ref, gamma_ref, beta_ref, w2_ref, b2_ref, o_ref, *,
                      n_true, eps):
    """Single-pass whole-batch kernel (used when everything fits in VMEM)."""
    # Linear(in_dim, n_hidden) WITHOUT bias: b1 is absorbed exactly by the batch mean.
    h = jnp.dot(x_ref[...], w1_ref[...], preferred_element_type=jnp.float32)
    inv_n = 1.0 / float(n_true)
    mean = jnp.sum(h, axis=0, keepdims=True) * inv_n
    # Biased batch variance (matches PyTorch forward normalization); clamp for fp safety.
    var = jnp.maximum(jnp.sum(h * h, axis=0, keepdims=True) * inv_n - mean * mean, 0.0)
    a = gamma_ref[...] * lax.rsqrt(var + eps)      # folded BN scale
    b = beta_ref[...] - mean * a                   # folded BN shift
    hn = jnp.maximum(h * a + b, 0.0)               # BatchNorm + ReLU
    # TODO(synk): Dropout(0.5) applied as identity (no stochastic mask / 1/(1-p) scale).
    out = jnp.dot(hn.astype(jnp.bfloat16), w2_ref[...],
                  preferred_element_type=jnp.float32) + b2_ref[...]
    o_ref[...] = out.astype(o_ref.dtype)


def _mlp_stats_kernel(x_ref, w1_ref, psum_ref, psumsq_ref):
    """Tiled path, pass 1: per-batch-tile partial sum / sum-of-squares of h = x @ w1."""
    h = jnp.dot(x_ref[...], w1_ref[...], preferred_element_type=jnp.float32)
    # Zero-padded rows contribute exactly 0 (no b1), so the partials stay exact.
    psum_ref[...] = jnp.sum(h, axis=0, keepdims=True)[None]        # (1, 1, h_dim)
    psumsq_ref[...] = jnp.sum(h * h, axis=0, keepdims=True)[None]  # (1, 1, h_dim)


def _mlp_project_kernel(x_ref, w1_ref, a_ref, b_ref, w2_ref, b2_ref, o_ref):
    """Tiled path, pass 2: recompute h, apply folded BN + ReLU, second GEMM."""
    h = jnp.dot(x_ref[...], w1_ref[...], preferred_element_type=jnp.float32)
    hn = jnp.maximum(h * a_ref[...] + b_ref[...], 0.0)
    # TODO(synk): Dropout(0.5) applied as identity (no stochastic mask / 1/(1-p) scale).
    out = jnp.dot(hn.astype(jnp.bfloat16), w2_ref[...],
                  preferred_element_type=jnp.float32) + b2_ref[...]
    o_ref[...] = out.astype(o_ref.dtype)


# --------------------------------------------------------------------------- wrapper
def mlp_forward(x, w1, b1, gamma, beta, w2, b2, *, tile_n=512, eps=BN_EPS,
                single_pass=None):
    # b1 is a no-op under training-mode BatchNorm (shift-invariance): mean absorbs it,
    # variance is unchanged.  Accepted for interface fidelity, never sent to the TPU.
    del b1

    n, in_dim = x.shape
    h_dim = w1.shape[1]
    out_dim = w2.shape[1]
    out_pad = pl.cdiv(out_dim, 128) * 128  # lane-dense output slab (unmasked stores)

    # bf16 operands for the MXU; f32 accumulation happens inside the kernels.
    xb = x.astype(jnp.bfloat16)
    w1b = w1.astype(jnp.bfloat16)
    w2b = w2.astype(jnp.bfloat16)
    gmf = jnp.asarray(gamma, jnp.float32).reshape(1, h_dim)
    btf = jnp.asarray(beta, jnp.float32).reshape(1, h_dim)
    b2f = jnp.asarray(b2, jnp.float32).reshape(1, out_dim)
    if out_pad != out_dim:
        w2b = jnp.pad(w2b, ((0, 0), (0, out_pad - out_dim)))
        b2f = jnp.pad(b2f, ((0, 0), (0, out_pad - out_dim)))

    cap = _vmem_capacity_bytes()

    # Rough fused-path VMEM footprint: operands (conservatively x2), f32 intermediates.
    fused_est = (2 * n * in_dim * 2
                 + 2 * (in_dim * h_dim + h_dim * out_pad) * 2
                 + 2 * n * out_pad * 4
                 + 4 * n * h_dim * 4
                 + 16 * h_dim * 4 + 4 * out_pad * 4)
    if single_pass is None:
        single_pass = fused_est <= cap // 2

    # ---------------------------------------------------------------- single-pass path
    if single_pass:
        out = pl.pallas_call(
            functools.partial(_mlp_fused_kernel, n_true=n, eps=eps),
            out_shape=jax.ShapeDtypeStruct((n, out_pad), jnp.float32),
            compiler_params=pltpu.CompilerParams(
                vmem_limit_bytes=_vmem_limit(fused_est, cap)),
        )(xb, w1b, gmf, btf, w2b, b2f)
        return out[:n, :out_dim]

    # ---------------------------------------------------------------- tiled two-call path
    # Batch tiling: sublane-aligned tile; batch zero-padded to a whole number of tiles.
    tile_n = max(8, (int(tile_n) // 8) * 8)
    tile_n = min(tile_n, ((n + 7) // 8) * 8)
    n_pad = pl.cdiv(n, tile_n) * tile_n
    num_tiles = n_pad // tile_n
    if n_pad != n:
        xb = jnp.pad(xb, ((0, n_pad - n), (0, 0)))  # zero rows contribute 0 to the stats

    # Pass 1: per-tile partial statistics.  Each tile writes its own output block, so the
    # batch axis is genuinely "parallel" (v7x megacore sharding).
    stats_est = (2 * tile_n * in_dim * 2 + 2 * in_dim * h_dim * 2
                 + 8 * h_dim * 4 + 2 * tile_n * h_dim * 4)
    psum, psumsq = pl.pallas_call(
        _mlp_stats_kernel,
        out_shape=(jax.ShapeDtypeStruct((num_tiles, 1, h_dim), jnp.float32),
                   jax.ShapeDtypeStruct((num_tiles, 1, h_dim), jnp.float32)),
        grid_spec=pltpu.PrefetchScalarGridSpec(
            num_scalar_prefetch=0,
            grid=(num_tiles,),
            in_specs=[pl.BlockSpec((tile_n, in_dim), lambda i: (i, 0)),   # x tile (streams)
                      pl.BlockSpec((in_dim, h_dim), lambda i: (0, 0))],   # w1 (resident)
            out_specs=(pl.BlockSpec((1, 1, h_dim), lambda i: (i, 0, 0)),
                       pl.BlockSpec((1, 1, h_dim), lambda i: (i, 0, 0))),
        ),
        compiler_params=pltpu.CompilerParams(
            dimension_semantics=("parallel",),
            vmem_limit_bytes=_vmem_limit(stats_est, cap)),
    )(xb, w1b)

    # Tiny combine + folded BN scale/shift, done once in plain XLA (h_dim-length vectors).
    inv_n = 1.0 / float(n)
    mean = jnp.sum(psum[:, 0, :], axis=0, keepdims=True) * inv_n
    var = jnp.maximum(jnp.sum(psumsq[:, 0, :], axis=0, keepdims=True) * inv_n
                      - mean * mean, 0.0)
    a_scale = gmf * lax.rsqrt(var + eps)
    b_shift = btf - mean * a_scale

    # Pass 2: normalize + project.  No cross-tile coupling left -> "parallel".
    # (Forward-looking: if h_dim/out_pad grow, tile w2 in multiples of 256 for v6e/v7x
    #  MXUs and consider single-buffering the resident weight BlockSpecs.)
    proj_est = (stats_est + 2 * h_dim * out_pad * 2 + 2 * tile_n * out_pad * 4
                + 2 * tile_n * h_dim * 4 + 8 * h_dim * 4 + 2 * out_pad * 4)
    out = pl.pallas_call(
        _mlp_project_kernel,
        out_shape=jax.ShapeDtypeStruct((n_pad, out_pad), jnp.float32),
        grid_spec=pltpu.PrefetchScalarGridSpec(
            num_scalar_prefetch=0,
            grid=(num_tiles,),
            in_specs=[pl.BlockSpec((tile_n, in_dim), lambda i: (i, 0)),   # x tile (streams)
                      pl.BlockSpec((in_dim, h_dim), lambda i: (0, 0)),    # w1 (resident)
                      pl.BlockSpec((1, h_dim), lambda i: (0, 0)),         # folded scale a
                      pl.BlockSpec((1, h_dim), lambda i: (0, 0)),         # folded shift b
                      pl.BlockSpec((h_dim, out_pad), lambda i: (0, 0)),   # w2 (resident)
                      pl.BlockSpec((1, out_pad), lambda i: (0, 0))],      # b2
            out_specs=pl.BlockSpec((tile_n, out_pad), lambda i: (i, 0)),
        ),
        compiler_params=pltpu.CompilerParams(
            dimension_semantics=("parallel",),
            vmem_limit_bytes=_vmem_limit(proj_est, cap)),
    )(xb, w1b, a_scale, b_shift, w2b, b2f)

    return out[:n, :out_dim]


def init_params(key, in_dim, n_hidden, out_dim):
    """Deterministic init mimicking PyTorch nn.Linear defaults (U(-1/sqrt(fan_in), ...))."""
    k1, k2, k3, k4 = jax.random.split(key, 4)
    lim1 = 1.0 / jnp.sqrt(in_dim)
    w1 = jax.random.uniform(k1, (in_dim, n_hidden), jnp.float32, -lim1, lim1)
    b1 = jax.random.uniform(k2, (1, n_hidden), jnp.float32, -lim1, lim1)
    gamma = jnp.ones((1, n_hidden), jnp.float32)   # BatchNorm1d weight init
    beta = jnp.zeros((1, n_hidden), jnp.float32)   # BatchNorm1d bias init
    lim2 = 1.0 / jnp.sqrt(n_hidden)
    w2 = jax.random.uniform(k3, (n_hidden, out_dim), jnp.float32, -lim2, lim2)
    b2 = jax.random.uniform(k4, (1, out_dim), jnp.float32, -lim2, lim2)
    return w1, b1, gamma, beta, w2, b2


if __name__ == "__main__":
    # Small shapes consistent with the module; N=200 exercises padding paths.
    N, IN_DIM, N_HIDDEN, OUT_DIM = 200, 16, 128, 16

    key = jax.random.PRNGKey(0)
    kx, kp = jax.random.split(key)
    x = jax.random.normal(kx, (N, IN_DIM), jnp.float32)
    w1, b1, gamma, beta, w2, b2 = init_params(kp, IN_DIM, N_HIDDEN, OUT_DIM)

    # Path 1: single-pass fused kernel (auto-selected: whole problem fits in VMEM).
    out_fused = mlp_forward(x, w1, b1, gamma, beta, w2, b2)
    jax.block_until_ready(out_fused)

    # Path 2: tiled two-call path (forced small tile -> 4 batch tiles + row padding).
    out_tiled = mlp_forward(x, w1, b1, gamma, beta, w2, b2, single_pass=False, tile_n=64)
    jax.block_until_ready(out_tiled)

    # Reference 1: mirrors the kernels' bf16-matmul / f32-accumulate numerics (b1-free,
    # which is exact for training-mode BN).
    xb = x.astype(jnp.bfloat16)
    h = jnp.dot(xb, w1.astype(jnp.bfloat16), preferred_element_type=jnp.float32)
    m = h.mean(0, keepdims=True)
    v = jnp.maximum((h * h).mean(0, keepdims=True) - m * m, 0.0)
    a = gamma * lax.rsqrt(v + BN_EPS)
    hn = jnp.maximum(h * a + (beta - m * a), 0.0)
    ref_bf16 = jnp.dot(hn.astype(jnp.bfloat16), w2.astype(jnp.bfloat16),
                       preferred_element_type=jnp.float32) + b2

    # Reference 2: full-f32 PyTorch-style forward (Linear WITH b1, training-mode BN,
    # identity dropout, Linear).  b1 is absorbed exactly by the batch mean.
    h32 = x @ w1 + b1
    m32 = h32.mean(0, keepdims=True)
    v32 = ((h32 - m32) ** 2).mean(0, keepdims=True)
    hn32 = jnp.maximum((h32 - m32) / jnp.sqrt(v32 + BN_EPS) * gamma + beta, 0.0)
    ref_f32 = hn32 @ w2 + b2

    for name, out in (("fused", out_fused), ("tiled", out_tiled)):
        assert out.shape == (N, OUT_DIM), (name, out.shape)
        assert jnp.allclose(out, ref_bf16, atol=2e-2, rtol=2e-2), f"{name}: mismatch vs bf16 ref"
        assert jnp.allclose(out, ref_f32, atol=5e-2, rtol=5e-2), f"{name}: mismatch vs f32 ref"
    assert jnp.allclose(out_fused, out_tiled, atol=2e-2, rtol=2e-2), "fused vs tiled mismatch"

    print("KERNEL_OK")
</pallas_src>

<mosaic_0001>
module attributes {stable_mosaic.version = 11 : i64} {
  func.func @_mlp_fused_kernel(%arg0: memref<200x16xbf16, #tpu.memory_space<vmem>>, %arg1: memref<16x128xbf16, #tpu.memory_space<vmem>>, %arg2: memref<1x128xf32, #tpu.memory_space<vmem>>, %arg3: memref<1x128xf32, #tpu.memory_space<vmem>>, %arg4: memref<128x128xbf16, #tpu.memory_space<vmem>>, %arg5: memref<1x128xf32, #tpu.memory_space<vmem>>, %arg6: memref<200x128xf32, #tpu.memory_space<vmem>>) attributes {dimension_semantics = [], scalar_prefetch = 0 : i64, scratch_operands = 0 : i64, tpu.core_type = #tpu.core_type<tc>} {
    %c0 = arith.constant 0 : index
    %c0_0 = arith.constant 0 : index
    %0 = vector.load %arg0[%c0, %c0_0] : memref<200x16xbf16, #tpu.memory_space<vmem>>, vector<200x16xbf16>
    %c0_1 = arith.constant 0 : index
    %c0_2 = arith.constant 0 : index
    %1 = vector.load %arg1[%c0_1, %c0_2] : memref<16x128xbf16, #tpu.memory_space<vmem>>, vector<16x128xbf16>
    %cst = arith.constant dense<0.000000e+00> : vector<200x128xf32>
    %2 = tpu.matmul %0, %1, %cst {dimension_numbers = #tpu.dot_dimension_numbers<[1], [0], [0], [1], [0, 0, 1, 1], [], []>} : vector<200x16xbf16>, vector<16x128xbf16>, vector<200x128xf32> -> vector<200x128xf32>
    %cst_3 = arith.constant dense<0.000000e+00> : vector<128xf32>
    %3 = vector.multi_reduction <add>, %2, %cst_3 [0] : vector<200x128xf32> to vector<128xf32>
    %4 = vector.shape_cast %3 : vector<128xf32> to vector<1x128xf32>
    %cst_4 = arith.constant 5.000000e-03 : f32
    %5 = vector.broadcast %cst_4 : f32 to vector<1x128xf32>
    %6 = arith.mulf %4, %5 : vector<1x128xf32>
    %7 = arith.mulf %2, %2 : vector<200x128xf32>
    %cst_5 = arith.constant dense<0.000000e+00> : vector<128xf32>
    %8 = vector.multi_reduction <add>, %7, %cst_5 [0] : vector<200x128xf32> to vector<128xf32>
    %9 = vector.shape_cast %8 : vector<128xf32> to vector<1x128xf32>
    %cst_6 = arith.constant 5.000000e-03 : f32
    %10 = vector.broadcast %cst_6 : f32 to vector<1x128xf32>
    %11 = arith.mulf %9, %10 : vector<1x128xf32>
    %12 = arith.mulf %6, %6 : vector<1x128xf32>
    %13 = arith.subf %11, %12 : vector<1x128xf32>
    %cst_7 = arith.constant 0.000000e+00 : f32
    %14 = vector.broadcast %cst_7 : f32 to vector<1x128xf32>
    %15 = arith.maximumf %13, %14 : vector<1x128xf32>
    %c0_8 = arith.constant 0 : index
    %c0_9 = arith.constant 0 : index
    %16 = vector.load %arg2[%c0_8, %c0_9] : memref<1x128xf32, #tpu.memory_space<vmem>>, vector<1x128xf32>
    %cst_10 = arith.constant 9.99999974E-6 : f32
    %17 = vector.broadcast %cst_10 : f32 to vector<1x128xf32>
    %18 = arith.addf %15, %17 : vector<1x128xf32>
    %19 = math.rsqrt %18 : vector<1x128xf32>
    %20 = arith.mulf %16, %19 : vector<1x128xf32>
    %c0_11 = arith.constant 0 : index
    %c0_12 = arith.constant 0 : index
    %21 = vector.load %arg3[%c0_11, %c0_12] : memref<1x128xf32, #tpu.memory_space<vmem>>, vector<1x128xf32>
    %22 = arith.mulf %6, %20 : vector<1x128xf32>
    %23 = arith.subf %21, %22 : vector<1x128xf32>
    %24 = vector.broadcast %20 : vector<1x128xf32> to vector<200x128xf32>
    %25 = arith.mulf %2, %24 : vector<200x128xf32>
    %26 = vector.broadcast %23 : vector<1x128xf32> to vector<200x128xf32>
    %27 = arith.addf %25, %26 : vector<200x128xf32>
    %cst_13 = arith.constant 0.000000e+00 : f32
    %28 = vector.broadcast %cst_13 : f32 to vector<200x128xf32>
    %29 = arith.maximumf %27, %28 : vector<200x128xf32>
    %30 = arith.truncf %29 : vector<200x128xf32> to vector<200x128xbf16>
    %c0_14 = arith.constant 0 : index
    %c0_15 = arith.constant 0 : index
    %31 = vector.load %arg4[%c0_14, %c0_15] : memref<128x128xbf16, #tpu.memory_space<vmem>>, vector<128x128xbf16>
    %cst_16 = arith.constant dense<0.000000e+00> : vector<200x128xf32>
    %32 = tpu.matmul %30, %31, %cst_16 {dimension_numbers = #tpu.dot_dimension_numbers<[1], [0], [0], [1], [0, 0, 1, 1], [], []>} : vector<200x128xbf16>, vector<128x128xbf16>, vector<200x128xf32> -> vector<200x128xf32>
    %c0_17 = arith.constant 0 : index
    %c0_18 = arith.constant 0 : index
    %33 = vector.load %arg5[%c0_17, %c0_18] : memref<1x128xf32, #tpu.memory_space<vmem>>, vector<1x128xf32>
    %34 = vector.broadcast %33 : vector<1x128xf32> to vector<200x128xf32>
    %35 = arith.addf %32, %34 : vector<200x128xf32>
    %c0_19 = arith.constant 0 : index
    %c0_20 = arith.constant 0 : index
    %36 = vector.load %arg6[%c0_19, %c0_20] : memref<200x128xf32, #tpu.memory_space<vmem>>, vector<200x128xf32>
    tpu.vector_store %arg6[%c0_19, %c0_20], %35 {strides = array<i32>} : memref<200x128xf32, #tpu.memory_space<vmem>>, vector<200x128xf32>,
    return
  }
}

</mosaic_0001>

<bundles_post_ra>
// kernel: tpu_custom_call.1
= control target key start
LH: loop header
LB: loop body
LE: loop exit
PB: predicated region body
PF: predicated region fallthrough
CT: control target
= control target key end

     0   :  { %v1004_v1 = vmov 0.0   ;;  %vm1005_vm0 = vmmov 0   ;;  %vm121_vm1 = vcmask 130048   ;;  %s1441_s0 = inlined_call_operand.vmem [shape: bf16[200,16], index: 0, kind: input, shape index: {}]   ;;  %s1442_s1 = inlined_call_operand.vmem [shape: bf16[16,128], index: 1, kind: input, shape index: {}]   ;;  %s1443_s2 = inlined_call_operand.vmem [shape: f32[1,128], index: 2, kind: input, shape index: {}]   ;;  %s1444_s3 = inlined_call_operand.vmem [shape: f32[1,128], index: 3, kind: input, shape index: {}]   ;;  %s1445_s4 = inlined_call_operand.vmem [shape: bf16[128,128], index: 4, kind: input, shape index: {}]   ;;  %s1446_s5 = inlined_call_operand.vmem [shape: f32[1,128], index: 5, kind: input, shape index: {}]   ;;  %s1447_s6 = inlined_call_operand.hbm [shape: f32[200,128], index: 6, kind: output, shape index: {}]  }
   0x1   :  { %v956_v0 = vld [vmem:[%s1442_s1] sm:$0xff]   ;;  %813 = vmatprep.subr.bf16.mxu0 %v1004_v1  ;;  %935 = vmatprep.subr.bf16.mxu1 %v1004_v1  ;;  %v958_v3 = vld [vmem:[%s1441_s0 + $0x8] sm:$0xff]   ;;  %v959_v4 = vld [vmem:[%s1441_s0 + $0x10] sm:$0xff]  }
   0x2   :  { %v957_v2 = vld [vmem:[%s1441_s0] sm:$0xff]   ;;  %814 = vmatpush3.bf16.msra.mxu0 %v956_v0  ;;  %815 = vmatprep.mubr.msk.bf16.mxu0 %vm1005_vm0, %v1004_v1 }
   0x3   :  { %867 = vmatprep.subr.bf16.mxu0 %v1004_v1  ;;  %887 = vmatprep.mubr.msk.bf16.mxu1 %vm1005_vm0, %v1004_v1 }
   0x5   :  { %816 = vmatmul.mubr.msk.bf16.vlgmr.msra.gmra.mrb[0].mxu0 %vm121_vm1, %v957_v2 }
   0x6   :  { %819 = vmatprep.mubr.msk.bf16.mxu0 %vm1005_vm0, %v1004_v1 }
   0xd   :  { %820 = vmatmul.mubr.msk.bf16.gmra.mrb[4].mxu0 %vm121_vm1, %v958_v3 }
   0xe   :  { %823 = vmatprep.mubr.msk.bf16.mxu0 %vm1005_vm0, %v1004_v1 }
   0xf   :  { %11 = vsyncpa [#allocation3], 0  ;;  %v960_v5 = vld [vmem:[%s1441_s0 + $0x18] sm:$0xff]   ;;  %v961_v6 = vld [vmem:[%s1441_s0 + $0x20] sm:$0xff]  }
  0x10   :  { %v962_v7 = vld [vmem:[%s1441_s0 + $0x28] sm:$0xff]   ;;  %v963_v8 = vld [vmem:[%s1441_s0 + $0x30] sm:$0xff]   ;;  %v964_v9 = vld [vmem:[%s1441_s0 + $0x38] sm:$0xff]  }
  0x11   :  { %v965_v10 = vld [vmem:[%s1441_s0 + $0x40] sm:$0xff]   ;;  %v966_v11 = vld [vmem:[%s1441_s0 + $0x48] sm:$0xff]   ;;  %v967_v12 = vld [vmem:[%s1441_s0 + $0x50] sm:$0xff]  }
  0x12   :  { %v968_v13 = vld [vmem:[%s1441_s0 + $0x58] sm:$0xff]   ;;  %v969_v14 = vld [vmem:[%s1441_s0 + $0x60] ss:$0 sps:$4 sm:$0xff]   ;;  %v971_v16 = vld [vmem:[%s1445_s4 + $0x8] sm:$0xff]  }
  0x13   :  { %v970_v15 = vld [vmem:[%s1445_s4] sm:$0xff]   ;;  %v972_v17 = vld [vmem:[%s1445_s4 + $0x10] sm:$0xff]   ;;  %v973_v18 = vld [vmem:[%s1445_s4 + $0x18] sm:$0xff]  }
  0x14   :  { %868 = vmatpush3.bf16.msra.mxu0 %v970_v15  ;;  %943 = vmatpush3.bf16.msra.mxu1 %v970_v15  ;;  %v974_v21 = vld [vmem:[%s1445_s4 + $0x20] sm:$0xff]   ;;  %v975_v28 = vld [vmem:[%s1445_s4 + $0x28] sm:$0xff]   ;;  %v976_v33 = vld [vmem:[%s1445_s4 + $0x30] sm:$0xff]  }
  0x15   :  { %824 = vmatmul.mubr.msk.bf16.gmra.mrb[8].mxu0 %vm121_vm1, %v959_v4  ;;  %869 = vmatprep.subr.bf16.mxu0 %v1004_v1  ;;  %v977_v39 = vld [vmem:[%s1445_s4 + $0x38] sm:$0xff]  }
  0x16   :  { %827 = vmatprep.mubr.msk.bf16.mxu0 %vm1005_vm0, %v1004_v1  ;;  %936 = vmatprep.subr.bf16.mxu1 %v1004_v1 }
  0x18   :  { %870 = vmatpush3.bf16.msra.mxu0 %v971_v16  ;;  %944 = vmatpush3.bf16.msra.mxu1 %v971_v16 }
  0x19   :  { %871 = vmatprep.subr.bf16.mxu0 %v1004_v1  ;;  %937 = vmatprep.subr.bf16.mxu1 %v1004_v1 }
  0x1c   :  { %872 = vmatpush3.bf16.msra.mxu0 %v972_v17  ;;  %945 = vmatpush3.bf16.msra.mxu1 %v972_v17 }
  0x1d   :  { %828 = vmatmul.mubr.msk.bf16.gmra.mrb[12].mxu0 %vm121_vm1, %v960_v5  ;;  %873 = vmatprep.subr.bf16.mxu0 %v1004_v1 }
  0x1e   :  { %831 = vmatprep.mubr.msk.bf16.mxu0 %vm1005_vm0, %v1004_v1  ;;  %938 = vmatprep.subr.bf16.mxu1 %v1004_v1 }
  0x20   :  { %874 = vmatpush3.bf16.msra.mxu0 %v973_v18  ;;  %946 = vmatpush3.bf16.msra.mxu1 %v973_v18 }
  0x21   :  { %875 = vmatprep.subr.bf16.mxu0 %v1004_v1  ;;  %939 = vmatprep.subr.bf16.mxu1 %v1004_v1 }
  0x24   :  { %876 = vmatpush3.bf16.msra.mxu0 %v974_v21  ;;  %947 = vmatpush3.bf16.msra.mxu1 %v974_v21 }
  0x25   :  { %832 = vmatmul.mubr.msk.bf16.gmra.mrb[16].mxu0 %vm121_vm1, %v961_v6  ;;  %877 = vmatprep.subr.bf16.mxu0 %v1004_v1 }
  0x26   :  { %835 = vmatprep.mubr.msk.bf16.mxu0 %vm1005_vm0, %v1004_v1  ;;  %940 = vmatprep.subr.bf16.mxu1 %v1004_v1 }
  0x28   :  { %878 = vmatpush3.bf16.msra.mxu0 %v975_v28  ;;  %948 = vmatpush3.bf16.msra.mxu1 %v975_v28 }
  0x29   :  { %879 = vmatprep.subr.bf16.mxu0 %v1004_v1  ;;  %941 = vmatprep.subr.bf16.mxu1 %v1004_v1 }
  0x2c   :  { %880 = vmatpush3.bf16.msra.mxu0 %v976_v33  ;;  %949 = vmatpush3.bf16.msra.mxu1 %v976_v33 }
  0x2d   :  { %836 = vmatmul.mubr.msk.bf16.gmra.mrb[20].mxu0 %vm121_vm1, %v962_v7  ;;  %881 = vmatprep.subr.bf16.mxu0 %v1004_v1 }
  0x2e   :  { %839 = vmatprep.mubr.msk.bf16.mxu0 %vm1005_vm0, %v1004_v1  ;;  %942 = vmatprep.subr.bf16.mxu1 %v1004_v1 }
  0x30   :  { %882 = vmatpush3.bf16.msra.mxu0 %v977_v39  ;;  %950 = vmatpush3.bf16.msra.mxu1 %v977_v39 }
  0x35   :  { %840 = vmatmul.mubr.msk.bf16.gmra.mrb[24].mxu0 %vm121_vm1, %v963_v8 }
  0x36   :  { %843 = vmatprep.mubr.msk.bf16.mxu0 %vm1005_vm0, %v1004_v1 }
  0x3d   :  { %844 = vmatmul.mubr.msk.bf16.gmra.mrb[28].mxu0 %vm121_vm1, %v964_v9 }
  0x3e   :  { %847 = vmatprep.mubr.msk.bf16.mxu0 %vm1005_vm0, %v1004_v1 }
  0x45   :  { %848 = vmatmul.mubr.msk.bf16.gmra.mrb[32].mxu0 %vm121_vm1, %v965_v10 }
  0x46   :  { %851 = vmatprep.mubr.msk.bf16.mxu0 %vm1005_vm0, %v1004_v1 }
  0x4d   :  { %852 = vmatmul.mubr.msk.bf16.gmra.mrb[36].mxu0 %vm121_vm1, %v966_v11 }
  0x4e   :  { %855 = vmatprep.mubr.msk.bf16.mxu0 %vm1005_vm0, %v1004_v1 }
  0x55   :  { %856 = vmatmul.mubr.msk.bf16.gmra.mrb[40].mxu0 %vm121_vm1, %v967_v12 }
  0x56   :  { %859 = vmatprep.mubr.msk.bf16.mxu0 %vm1005_vm0, %v1004_v1 }
  0x5d   :  { %860 = vmatmul.mubr.msk.bf16.gmra.mrb[44].mxu0 %vm121_vm1, %v968_v13 }
  0x5e   :  { %863 = vmatprep.mubr.msk.bf16.mxu0 %vm1005_vm0, %v1004_v1 }
  0x65   :  { %864 = vmatmul.mubr.msk.bf16.gmra.mrb[48].mxu0 %vm121_vm1, %v969_v14 }
  0x66   :  { %883 = vmatprep.mubr.msk.bf16.mxu0 %vm1005_vm0, %v1004_v1 }
  0xd8   :  { %v1150_v19 = vpop.f32.mrb[0].mxu0 }
  0xd9   :  { %v817_v20 = vpop.f32.mrb[1].mxu0  ;;  %v328_v23 = vmul.f32 %v1150_v19, %v1150_v19 }
  0xda   :  { %v1157_v22 = vpop.f32.mrb[2].mxu0 }
  0xdb   :  { %v297_v24 = vadd.f32 %v1157_v22, %v1150_v19  ;;  %v329_v25 = vmul.f32 %v1157_v22, %v1157_v22  ;;  %v818_v26 = vpop.f32.mrb[3].mxu0 }
  0xdd   :  { %v353_v27 = vadd.f32 %v329_v25, %v328_v23 }
  0xe0   :  { %v1170_v29 = vpop.f32.mrb[4].mxu0 }
  0xe1   :  { %v298_v30 = vadd.f32 %v297_v24, %v1170_v29  ;;  %v330_v31 = vmul.f32 %v1170_v29, %v1170_v29  ;;  %v821_v32 = vpop.f32.mrb[5].mxu0 }
  0xe2   :  { %v1180_v34 = vpop.f32.mrb[6].mxu0 }
  0xe3   :  { %v354_v35 = vadd.f32 %v353_v27, %v330_v31  ;;  %v299_v36 = vadd.f32 %v298_v30, %v1180_v34  ;;  %v331_v37 = vmul.f32 %v1180_v34, %v1180_v34  ;;  %v822_v38 = vpop.f32.mrb[7].mxu0 }
  0xe5   :  { %v355_v40 = vadd.f32 %v354_v35, %v331_v37 }
  0xe8   :  { %v1190_v41 = vpop.f32.mrb[8].mxu0 }
  0xe9   :  { %v300_v42 = vadd.f32 %v299_v36, %v1190_v41  ;;  %v332_v43 = vmul.f32 %v1190_v41, %v1190_v41  ;;  %v825_v44 = vpop.f32.mrb[9].mxu0 }
  0xea   :  { %v1195_v45 = vpop.f32.mrb[10].mxu0 }
  0xeb   :  { %v356_v46 = vadd.f32 %v355_v40, %v332_v43  ;;  %v301_v47 = vadd.f32 %v300_v42, %v1195_v45  ;;  %v333_v48 = vmul.f32 %v1195_v45, %v1195_v45  ;;  %v826_v49 = vpop.f32.mrb[11].mxu0 }
  0xed   :  { %v357_v50 = vadd.f32 %v356_v46, %v333_v48 }
  0xf0   :  { %v1200_v51 = vpop.f32.mrb[12].mxu0 }
  0xf1   :  { %v302_v52 = vadd.f32 %v301_v47, %v1200_v51  ;;  %v334_v53 = vmul.f32 %v1200_v51, %v1200_v51  ;;  %v829_v54 = vpop.f32.mrb[13].mxu0 }
  0xf2   :  { %v1205_v55 = vpop.f32.mrb[14].mxu0 }
  0xf3   :  { %v358_v56 = vadd.f32 %v357_v50, %v334_v53  ;;  %v303_v57 = vadd.f32 %v302_v52, %v1205_v55  ;;  %v335_v58 = vmul.f32 %v1205_v55, %v1205_v55  ;;  %v830_v59 = vpop.f32.mrb[15].mxu0 }
  0xf5   :  { %v359_v60 = vadd.f32 %v358_v56, %v335_v58 }
  0xf8   :  { %v1210_v61 = vpop.f32.mrb[16].mxu0 }
  0xf9   :  { %v304_v62 = vadd.f32 %v303_v57, %v1210_v61  ;;  %v336_v63 = vmul.f32 %v1210_v61, %v1210_v61  ;;  %v833_v0 = vpop.f32.mrb[17].mxu0 }
  0xfa   :  { %v1215_v2 = vpop.f32.mrb[18].mxu0 }
  0xfb   :  { %v360_v3 = vadd.f32 %v359_v60, %v336_v63  ;;  %v305_v4 = vadd.f32 %v304_v62, %v1215_v2  ;;  %v337_v5 = vmul.f32 %v1215_v2, %v1215_v2  ;;  %v834_v6 = vpop.f32.mrb[19].mxu0 }
  0xfd   :  { %v361_v7 = vadd.f32 %v360_v3, %v337_v5 }
 0x100   :  { %v1220_v8 = vpop.f32.mrb[20].mxu0 }
 0x101   :  { %v306_v9 = vadd.f32 %v305_v4, %v1220_v8  ;;  %v338_v10 = vmul.f32 %v1220_v8, %v1220_v8  ;;  %v837_v11 = vpop.f32.mrb[21].mxu0 }
 0x102   :  { %v1225_v12 = vpop.f32.mrb[22].mxu0 }
 0x103   :  { %v362_v13 = vadd.f32 %v361_v7, %v338_v10  ;;  %v307_v14 = vadd.f32 %v306_v9, %v1225_v12  ;;  %v339_v15 = vmul.f32 %v1225_v12, %v1225_v12  ;;  %v838_v16 = vpop.f32.mrb[23].mxu0 }
 0x105   :  { %v363_v17 = vadd.f32 %v362_v13, %v339_v15 }
 0x108   :  { %v1230_v18 = vpop.f32.mrb[24].mxu0 }
 0x109   :  { %v308_v20 = vadd.f32 %v307_v14, %v1230_v18  ;;  %v340_v21 = vmul.f32 %v1230_v18, %v1230_v18  ;;  %v841_v23 = vpop.f32.mrb[25].mxu0 }
 0x10a   :  { %v1235_v24 = vpop.f32.mrb[26].mxu0 }
 0x10b   :  { %v364_v25 = vadd.f32 %v363_v17, %v340_v21  ;;  %v309_v26 = vadd.f32 %v308_v20, %v1235_v24  ;;  %v341_v27 = vmul.f32 %v1235_v24, %v1235_v24  ;;  %v842_v28 = vpop.f32.mrb[27].mxu0 }
 0x10d   :  { %v365_v30 = vadd.f32 %v364_v25, %v341_v27 }
 0x110   :  { %v1240_v31 = vpop.f32.mrb[28].mxu0 }
 0x111   :  { %v310_v32 = vadd.f32 %v309_v26, %v1240_v31  ;;  %v342_v33 = vmul.f32 %v1240_v31, %v1240_v31  ;;  %v845_v35 = vpop.f32.mrb[29].mxu0 }
 0x112   :  { %v1245_v36 = vpop.f32.mrb[30].mxu0 }
 0x113   :  { %v366_v37 = vadd.f32 %v365_v30, %v342_v33  ;;  %v311_v38 = vadd.f32 %v310_v32, %v1245_v36  ;;  %v343_v39 = vmul.f32 %v1245_v36, %v1245_v36  ;;  %v846_v40 = vpop.f32.mrb[31].mxu0 }
 0x115   :  { %v367_v42 = vadd.f32 %v366_v37, %v343_v39 }
 0x118   :  { %v1250_v43 = vpop.f32.mrb[32].mxu0 }
 0x119   :  { %v312_v44 = vadd.f32 %v311_v38, %v1250_v43  ;;  %v344_v46 = vmul.f32 %v1250_v43, %v1250_v43  ;;  %v849_v47 = vpop.f32.mrb[33].mxu0 }
 0x11a   :  { %v1255_v48 = vpop.f32.mrb[34].mxu0 }
 0x11b   :  { %v368_v49 = vadd.f32 %v367_v42, %v344_v46  ;;  %v313_v50 = vadd.f32 %v312_v44, %v1255_v48  ;;  %v345_v52 = vmul.f32 %v1255_v48, %v1255_v48  ;;  %v850_v53 = vpop.f32.mrb[35].mxu0 }
 0x11d   :  { %v369_v54 = vadd.f32 %v368_v49, %v345_v52 }
 0x120   :  { %v1260_v56 = vpop.f32.mrb[36].mxu0 }
 0x121   :  { %v314_v57 = vadd.f32 %v313_v50, %v1260_v56  ;;  %v346_v58 = vmul.f32 %v1260_v56, %v1260_v56  ;;  %v853_v59 = vpop.f32.mrb[37].mxu0 }
 0x122   :  { %v1265_v60 = vpop.f32.mrb[38].mxu0 }
 0x123   :  { %v370_v62 = vadd.f32 %v369_v54, %v346_v58  ;;  %v315_v63 = vadd.f32 %v314_v57, %v1265_v60  ;;  %v347_v0 = vmul.f32 %v1265_v60, %v1265_v60  ;;  %v854_v3 = vpop.f32.mrb[39].mxu0 }
 0x125   :  { %v371_v4 = vadd.f32 %v370_v62, %v347_v0 }
 0x128   :  { %v1270_v5 = vpop.f32.mrb[40].mxu0 }
 0x129   :  { %v316_v6 = vadd.f32 %v315_v63, %v1270_v5  ;;  %v348_v7 = vmul.f32 %v1270_v5, %v1270_v5  ;;  %v857_v9 = vpop.f32.mrb[41].mxu0 }
 0x12a   :  { %v1275_v10 = vpop.f32.mrb[42].mxu0  ;;  %v395_v9 = vlaneseq }
 0x12b   :  { %v372_v11 = vadd.f32 %v371_v4, %v348_v7  ;;  %v317_v13 = vadd.f32 %v316_v6, %v1275_v10  ;;  %v349_v14 = vmul.f32 %v1275_v10, %v1275_v10  ;;  %v858_v15 = vpop.f32.mrb[43].mxu0 }
 0x12d   :  { %v373_v16 = vadd.f32 %v372_v11, %v349_v14  ;;  %v396_v11 = vshrl.u32 %v395_v9, 7 }
 0x12f   :  { %v397_v14 = vsub.s32 0, %v396_v11 }
 0x130   :  { %v1280_v17 = vpop.f32.mrb[44].mxu0 }
 0x131   :  { %v318_v20 = vadd.f32 %v317_v13, %v1280_v17  ;;  %v350_v21 = vmul.f32 %v1280_v17, %v1280_v17  ;;  %v861_v23 = vpop.f32.mrb[45].mxu0  ;;  %v387_v13 = vld [vmem:[%s1443_s2] sm:$0x1] }
 0x132   :  { %v1285_v25 = vpop.f32.mrb[46].mxu0 }
 0x133   :  { %v374_v26 = vadd.f32 %v373_v16, %v350_v21  ;;  %v319_v27 = vadd.f32 %v318_v20, %v1285_v25  ;;  %v351_v28 = vmul.f32 %v1285_v25, %v1285_v25  ;;  %v862_v30 = vpop.f32.mrb[47].mxu0  ;;  %v391_v20 = vld [vmem:[%s1444_s3] sm:$0x1] }
 0x135   :  { %v375_v32 = vadd.f32 %v374_v26, %v351_v28 }
 0x138   :  { %v291_v33 = vpop.f32.mrb[48].mxu0 }
 0x139   :  { %v320_v35 = vadd.f32 %v319_v27, %v291_v33  ;;  %v352_v37 = vmul.f32 %v291_v33, %v291_v33  ;;  %v865_v38 = vpop.f32.mrb[49].mxu0 }
 0x13a   :  { %v294_v39 = vpop.f32.mrb[50].mxu0 }
 0x13b   :  { %v321_v40 = vrot.slane %v320_v35, 4  ;;  %v376_v42 = vadd.f32 %v375_v32, %v352_v37  ;;  %v866_v44 = vpop.f32.mrb[51].mxu0 }
 0x13d   :  { %v322_v46 = vadd.f32 %v321_v40, %v320_v35  ;;  %v377_v47 = vrot.slane %v376_v42, 4 }
 0x13f   :  { %v323_v49 = vrot.slane %v322_v46, 2  ;;  %v378_v50 = vadd.f32 %v377_v47, %v376_v42 }
 0x141   :  { %v324_v52 = vadd.f32 %v323_v49, %v322_v46  ;;  %v379_v53 = vrot.slane %v378_v50, 2 }
 0x143   :  { %v325_v54 = vrot.slane %v324_v52, 1  ;;  %v380_v57 = vadd.f32 %v379_v53, %v378_v50 }
 0x145   :  { %v326_v58 = vadd.f32 %v325_v54, %v324_v52  ;;  %v381_v59 = vrot.slane %v380_v57, 1 }
 0x147   :  { %v327_v62 = vmul.f32 0.005, %v326_v58  ;;  %v382_v63 = vadd.f32 %v381_v59, %v380_v57 }
 0x149   :  { %v383_v0 = vmul.f32 0.005, %v382_v63  ;;  %v384_v3 = vmul.f32 %v327_v62, %v327_v62 }
 0x14b   :  { %v385_v4 = vsub.f32 %v383_v0, %v384_v3 }
 0x14d   :  { %v386_v6 = vmax.f32 %v385_v4, 0.0 }
 0x14f   :  { %v388_v7 = vadd.f32 1e-05, %v386_v6 }
 0x151   :  { %978 = vrsqrt.f32 %v388_v7 }
 0x15b   :  { %v979_v15 = vpop.eup %978 }
 0x15c   :  { %v390_v16 = vmul.f32 %v979_v15, %v387_v13 }
 0x15e   :  { %v392_v21 = vmul.f32 %v390_v16, %v327_v62  ;;  %v1296_v23 = vrot.slane %v390_v16, %v397_v14 }
 0x160   :  { %v393_v26 = vsub.f32 %v391_v20, %v392_v21  ;;  %v1299_v27 = vmul.f32 %v1296_v23, %v291_v33  ;;  %v400_v28 = vmul.f32 %v1296_v23, %v1150_v19  ;;  %v401_v30 = vmul.f32 %v1296_v23, %v1157_v22 }
 0x161   :  { %v402_v32 = vmul.f32 %v1296_v23, %v1170_v29  ;;  %v403_v35 = vmul.f32 %v1296_v23, %v1180_v34  ;;  %v404_v37 = vmul.f32 %v1296_v23, %v1190_v41  ;;  %v405_v38 = vmul.f32 %v1296_v23, %v1195_v45 }
 0x162   :  { %v1313_v33 = vrot.slane %v393_v26, %v397_v14  ;;  %v406_v19 = vmul.f32 %v1296_v23, %v1200_v51  ;;  %v407_v22 = vmul.f32 %v1296_v23, %v1205_v55  ;;  %v408_v29 = vmul.f32 %v1296_v23, %v1210_v61 }
 0x163   :  { %v409_v34 = vmul.f32 %v1296_v23, %v1215_v2  ;;  %v410_v41 = vmul.f32 %v1296_v23, %v1220_v8  ;;  %v411_v45 = vmul.f32 %v1296_v23, %v1225_v12  ;;  %v412_v39 = vmul.f32 %v1296_v23, %v1230_v18 }
 0x164   :  { %v431_v51 = vadd.f32 %v1313_v33, %v400_v28  ;;  %v432_v40 = vadd.f32 %v1313_v33, %v401_v30  ;;  %v433_v55 = vadd.f32 %v1313_v33, %v402_v32  ;;  %v434_v61 = vadd.f32 %v1313_v33, %v403_v35 }
 0x165   :  { %v435_v42 = vadd.f32 %v1313_v33, %v404_v37  ;;  %v436_v2 = vadd.f32 %v1313_v33, %v405_v38  ;;  %v437_v8 = vadd.f32 %v1313_v33, %v406_v19  ;;  %v438_v44 = vadd.f32 %v1313_v33, %v407_v22 }
 0x166   :  { %v456_v12 = vmax.f32 %v431_v51, 0.0  ;;  %v457_v46 = vmax.f32 %v432_v40, 0.0  ;;  %v458_v47 = vmax.f32 %v433_v55, 0.0  ;;  %v459_v18 = vmax.f32 %v434_v61, 0.0 }
 0x167   :  { %v460_v49 = vmax.f32 %v435_v42, 0.0  ;;  %v461_v50 = vmax.f32 %v436_v2, 0.0  ;;  %v462_v52 = vmax.f32 %v437_v8, 0.0  ;;  %v463_v53 = vmax.f32 %v438_v44, 0.0 }
 0x168   :  { %v481_v54 = vpack.c.bf16 %v457_v46, %v456_v12  ;;  %v482_v57 = vpack.c.bf16 %v459_v18, %v458_v47  ;;  %v439_v58 = vadd.f32 %v1313_v33, %v408_v29  ;;  %v440_v59 = vadd.f32 %v1313_v33, %v409_v34 }
 0x169   :  { %v483_v62 = vpack.c.bf16 %v461_v50, %v460_v49  ;;  %v484_v63 = vpack.c.bf16 %v463_v53, %v462_v52  ;;  %v441_v0 = vadd.f32 %v1313_v33, %v410_v41  ;;  %v442_v3 = vadd.f32 %v1313_v33, %v411_v45 }
 0x16a   :  { %884 = vmatmul.mubr.bf16.vlgmr.msra.gmra.mrb[52].mxu0 %v481_v54  ;;  %888 = vmatmul.mubr.bf16.vlgmr.msra.gmra.mrb[0].mxu1 %v482_v57  ;;  %v464_v4 = vmax.f32 %v439_v58, 0.0  ;;  %v465_v6 = vmax.f32 %v440_v59, 0.0  ;;  %v413_v7 = vmul.f32 %v1296_v23, %v1235_v24  ;;  %v443_v9 = vadd.f32 %v1313_v33, %v412_v39 }
 0x16b   :  { %891 = vmatprep.mubr.msk.bf16.mxu1 %vm1005_vm0, %v1004_v1  ;;  %v466_v11 = vmax.f32 %v441_v0, 0.0  ;;  %v467_v13 = vmax.f32 %v442_v3, 0.0  ;;  %v414_v14 = vmul.f32 %v1296_v23, %v1240_v31  ;;  %v415_v15 = vmul.f32 %v1296_v23, %v1245_v36 }
 0x16c   :  { %v485_v16 = vpack.c.bf16 %v465_v6, %v464_v4  ;;  %v444_v20 = vadd.f32 %v1313_v33, %v413_v7  ;;  %v468_v21 = vmax.f32 %v443_v9, 0.0  ;;  %v416_v24 = vmul.f32 %v1296_v23, %v1250_v43 }
 0x16d   :  { %v486_v26 = vpack.c.bf16 %v467_v13, %v466_v11  ;;  %v445_v28 = vadd.f32 %v1313_v33, %v414_v14  ;;  %v446_v30 = vadd.f32 %v1313_v33, %v415_v15  ;;  %v417_v32 = vmul.f32 %v1296_v23, %v1255_v48 }
 0x16e   :  { %v469_v35 = vmax.f32 %v444_v20, 0.0  ;;  %v447_v31 = vadd.f32 %v1313_v33, %v416_v24  ;;  %v418_v36 = vmul.f32 %v1296_v23, %v1260_v56  ;;  %v419_v37 = vmul.f32 %v1296_v23, %v1265_v60 }
 0x16f   :  { %v470_v38 = vmax.f32 %v445_v28, 0.0  ;;  %v471_v19 = vmax.f32 %v446_v30, 0.0  ;;  %v448_v43 = vadd.f32 %v1313_v33, %v417_v32  ;;  %v420_v22 = vmul.f32 %v1296_v23, %v1270_v5 }
 0x170   :  { %v487_v29 = vpack.c.bf16 %v469_v35, %v468_v21  ;;  %v472_v34 = vmax.f32 %v447_v31, 0.0  ;;  %v449_v48 = vadd.f32 %v1313_v33, %v418_v36  ;;  %v450_v41 = vadd.f32 %v1313_v33, %v419_v37 }
 0x171   :  { %v488_v45 = vpack.c.bf16 %v471_v19, %v470_v38  ;;  %v473_v39 = vmax.f32 %v448_v43, 0.0  ;;  %v421_v56 = vmul.f32 %v1296_v23, %v1275_v10  ;;  %v451_v60 = vadd.f32 %v1313_v33, %v420_v22 }
 0x172   :  { %892 = vmatmul.mubr.bf16.gmra.mrb[4].mxu1 %v483_v62  ;;  %v474_v51 = vmax.f32 %v449_v48, 0.0  ;;  %v475_v40 = vmax.f32 %v450_v41, 0.0  ;;  %v422_v55 = vmul.f32 %v1296_v23, %v1280_v17  ;;  %v423_v5 = vmul.f32 %v1296_v23, %v1285_v25 }
 0x173   :  { %895 = vmatprep.mubr.msk.bf16.mxu1 %vm1005_vm0, %v1004_v1  ;;  %v489_v61 = vpack.c.bf16 %v473_v39, %v472_v34  ;;  %v452_v42 = vadd.f32 %v1313_v33, %v421_v56  ;;  %v476_v2 = vmax.f32 %v451_v60, 0.0  ;;  %v455_v10 = vadd.f32 %v1313_v33, %v1299_v27 }
 0x174   :  { %v490_v8 = vpack.c.bf16 %v475_v40, %v474_v51  ;;  %v453_v44 = vadd.f32 %v1313_v33, %v422_v55  ;;  %v454_v12 = vadd.f32 %v1313_v33, %v423_v5  ;;  %v1402_v33 = vld [vmem:[%s1446_s5] ss:$0 sm:$0xff]  ;;  %s1006_s5 = smov [#allocation2]  }
 0x175   :  { %v477_v46 = vmax.f32 %v452_v42, 0.0  ;;  %v480_v23 = vmax.f32 %v455_v10, 0.0  ;;  %s731_s17 = sshll.u32 %s1006_s5, 4  ;;  %s732_s17 = int_to_ptr.vmem [resolvable:$true] %s731_s17 }
 0x176   :  { %v478_v17 = vmax.f32 %v453_v44, 0.0  ;;  %v479_v47 = vmax.f32 %v454_v12, 0.0  ;;  %s980_s18 = scalar_lea.vmem %s732_s17, 3200  ;;  %p985_p1 = scmp.lt.s32.totalorder %s732_s17, %s732_s17 }
 0x177   :  { %v491_v18 = vpack.c.bf16 %v477_v46, %v476_v2  ;;  %v493_v27 = vpack.c.bf16 %v480_v23, %v480_v23  ;;  %p981_p0 = scmp.ne.s32.totalorder %s732_s17, %s980_s18  ;;  %p986_p2 = scmp.lt.s32.totalorder %s980_s18, %s980_s18 }
 0x178   :  { %v492_v25 = vpack.c.bf16 %v479_v47, %v478_v17 }
 0x179   :  { %p987_p3 = por %p986_p2, %p985_p1 }
 0x17a   :  { %896 = vmatmul.mubr.bf16.gmra.mrb[8].mxu1 %v484_v63 }
 0x17b   :  { %899 = vmatprep.mubr.msk.bf16.mxu1 %vm1005_vm0, %v1004_v1  ;;  %p988_p4 = pnand %p987_p3, %p981_p0 }
 0x182   :  { %900 = vmatmul.mubr.bf16.gmra.mrb[12].mxu1 %v485_v16 }
 0x183   :  { %903 = vmatprep.mubr.msk.bf16.mxu1 %vm1005_vm0, %v1004_v1 }
 0x18a   :  { %904 = vmatmul.mubr.bf16.gmra.mrb[16].mxu1 %v486_v26 }
 0x18b   :  { %907 = vmatprep.mubr.msk.bf16.mxu1 %vm1005_vm0, %v1004_v1 }
 0x192   :  { %908 = vmatmul.mubr.bf16.gmra.mrb[20].mxu1 %v487_v29 }
 0x193   :  { %911 = vmatprep.mubr.msk.bf16.mxu1 %vm1005_vm0, %v1004_v1 }
 0x19a   :  { %912 = vmatmul.mubr.bf16.gmra.mrb[24].mxu1 %v488_v45 }
 0x19b   :  { %915 = vmatprep.mubr.msk.bf16.mxu1 %vm1005_vm0, %v1004_v1 }
 0x1a2   :  { %916 = vmatmul.mubr.bf16.gmra.mrb[28].mxu1 %v489_v61 }
 0x1a3   :  { %919 = vmatprep.mubr.msk.bf16.mxu1 %vm1005_vm0, %v1004_v1 }
 0x1aa   :  { %920 = vmatmul.mubr.bf16.gmra.mrb[32].mxu1 %v490_v8 }
 0x1ab   :  { %923 = vmatprep.mubr.msk.bf16.mxu1 %vm1005_vm0, %v1004_v1 }
 0x1b2   :  { %924 = vmatmul.mubr.bf16.gmra.mrb[36].mxu1 %v491_v18 }
 0x1b3   :  { %927 = vmatprep.mubr.msk.bf16.mxu1 %vm1005_vm0, %v1004_v1 }
 0x1ba   :  { %928 = vmatmul.mubr.bf16.gmra.mrb[40].mxu1 %v492_v25 }
 0x1bb   :  { %931 = vmatprep.mubr.msk.bf16.mxu1 %vm1005_vm0, %v1004_v1 }
 0x1c2   :  { %932 = vmatmul.mubr.bf16.gmra.mrb[44].mxu1 %v493_v27 }
 0x23d   :  { %v599_v49 = vpop.f32.mrb[52].mxu0  ;;  %v607_v50 = vpop.f32.mrb[0].mxu1 }
 0x23e   :  { %v600_v52 = vadd.f32 %v1402_v33, %v599_v49  ;;  %v608_v53 = vadd.f32 %v1402_v33, %v607_v50  ;;  %v885_v54 = vpop.f32.mrb[53].mxu0  ;;  %v889_v57 = vpop.f32.mrb[1].mxu1 }
 0x23f   :  { %v602_v58 = vpop.f32.mrb[54].mxu0  ;;  %v610_v59 = vpop.f32.mrb[2].mxu1 }
 0x240   :  { %701 = vst [vmem:[#allocation2] sm:$0xff] %v600_v52  ;;  %703 = vst [vmem:[#allocation2 + $0x10] sm:$0xff] %v608_v53  ;;  %v603_v1 = vadd.f32 %v1402_v33, %v602_v58  ;;  %v611_v62 = vadd.f32 %v1402_v33, %v610_v59  ;;  %v886_v63 = vpop.f32.mrb[55].mxu0  ;;  %v890_v0 = vpop.f32.mrb[3].mxu1 }
 0x242   :  { %702 = vst [vmem:[#allocation2 + $0x8] sm:$0xff] %v603_v1  ;;  %704 = vst [vmem:[#allocation2 + $0x18] sm:$0xff] %v611_v62 }
 0x245   :  { %v615_v3 = vpop.f32.mrb[4].mxu1 }
 0x246   :  { %v616_v4 = vadd.f32 %v1402_v33, %v615_v3  ;;  %v893_v6 = vpop.f32.mrb[5].mxu1 }
 0x247   :  { %v618_v7 = vpop.f32.mrb[6].mxu1 }
 0x248   :  { %705 = vst [vmem:[#allocation2 + $0x20] sm:$0xff] %v616_v4  ;;  %v619_v9 = vadd.f32 %v1402_v33, %v618_v7  ;;  %v894_v11 = vpop.f32.mrb[7].mxu1 }
 0x24a   :  { %706 = vst [vmem:[#allocation2 + $0x28] sm:$0xff] %v619_v9 }
 0x24d   :  { %v623_v13 = vpop.f32.mrb[8].mxu1 }
 0x24e   :  { %v624_v14 = vadd.f32 %v1402_v33, %v623_v13  ;;  %v897_v15 = vpop.f32.mrb[9].mxu1 }
 0x24f   :  { %v626_v16 = vpop.f32.mrb[10].mxu1 }
 0x250   :  { %707 = vst [vmem:[#allocation2 + $0x30] sm:$0xff] %v624_v14  ;;  %v627_v20 = vadd.f32 %v1402_v33, %v626_v16  ;;  %v898_v21 = vpop.f32.mrb[11].mxu1 }
 0x252   :  { %708 = vst [vmem:[#allocation2 + $0x38] sm:$0xff] %v627_v20 }
 0x255   :  { %v631_v24 = vpop.f32.mrb[12].mxu1 }
 0x256   :  { %v632_v26 = vadd.f32 %v1402_v33, %v631_v24  ;;  %v901_v28 = vpop.f32.mrb[13].mxu1 }
 0x257   :  { %v634_v30 = vpop.f32.mrb[14].mxu1 }
 0x258   :  { %709 = vst [vmem:[#allocation2 + $0x40] sm:$0xff] %v632_v26  ;;  %v635_v32 = vadd.f32 %v1402_v33, %v634_v30  ;;  %v902_v35 = vpop.f32.mrb[15].mxu1 }
 0x25a   :  { %710 = vst [vmem:[#allocation2 + $0x48] sm:$0xff] %v635_v32 }
 0x25d   :  { %v639_v31 = vpop.f32.mrb[16].mxu1 }
 0x25e   :  { %v640_v36 = vadd.f32 %v1402_v33, %v639_v31  ;;  %v905_v37 = vpop.f32.mrb[17].mxu1 }
 0x25f   :  { %v642_v38 = vpop.f32.mrb[18].mxu1 }
 0x260   :  { %711 = vst [vmem:[#allocation2 + $0x50] sm:$0xff] %v640_v36  ;;  %v643_v19 = vadd.f32 %v1402_v33, %v642_v38  ;;  %v906_v43 = vpop.f32.mrb[19].mxu1 }
 0x262   :  { %712 = vst [vmem:[#allocation2 + $0x58] sm:$0xff] %v643_v19 }
 0x265   :  { %v647_v22 = vpop.f32.mrb[20].mxu1 }
 0x266   :  { %v648_v29 = vadd.f32 %v1402_v33, %v647_v22  ;;  %v909_v34 = vpop.f32.mrb[21].mxu1 }
 0x267   :  { %v650_v48 = vpop.f32.mrb[22].mxu1 }
 0x268   :  { %713 = vst [vmem:[#allocation2 + $0x60] sm:$0xff] %v648_v29  ;;  %v651_v41 = vadd.f32 %v1402_v33, %v650_v48  ;;  %v910_v45 = vpop.f32.mrb[23].mxu1 }
 0x26a   :  { %714 = vst [vmem:[#allocation2 + $0x68] sm:$0xff] %v651_v41 }
 0x26d   :  { %v655_v39 = vpop.f32.mrb[24].mxu1 }
 0x26e   :  { %v656_v56 = vadd.f32 %v1402_v33, %v655_v39  ;;  %v913_v60 = vpop.f32.mrb[25].mxu1 }
 0x26f   :  { %v658_v51 = vpop.f32.mrb[26].mxu1 }
 0x270   :  { %715 = vst [vmem:[#allocation2 + $0x70] sm:$0xff] %v656_v56  ;;  %v659_v40 = vadd.f32 %v1402_v33, %v658_v51  ;;  %v914_v55 = vpop.f32.mrb[27].mxu1 }
 0x272   :  { %716 = vst [vmem:[#allocation2 + $0x78] sm:$0xff] %v659_v40 }
 0x275   :  { %v663_v5 = vpop.f32.mrb[28].mxu1 }
 0x276   :  { %v664_v61 = vadd.f32 %v1402_v33, %v663_v5  ;;  %v917_v42 = vpop.f32.mrb[29].mxu1 }
 0x277   :  { %v666_v2 = vpop.f32.mrb[30].mxu1 }
 0x278   :  { %717 = vst [vmem:[#allocation2 + $0x80] sm:$0xff] %v664_v61  ;;  %v667_v10 = vadd.f32 %v1402_v33, %v666_v2  ;;  %v918_v8 = vpop.f32.mrb[31].mxu1 }
 0x27a   :  { %718 = vst [vmem:[#allocation2 + $0x88] sm:$0xff] %v667_v10 }
 0x27d   :  { %v671_v44 = vpop.f32.mrb[32].mxu1 }
 0x27e   :  { %v672_v12 = vadd.f32 %v1402_v33, %v671_v44  ;;  %v921_v46 = vpop.f32.mrb[33].mxu1 }
 0x27f   :  { %v674_v17 = vpop.f32.mrb[34].mxu1 }
 0x280   :  { %719 = vst [vmem:[#allocation2 + $0x90] sm:$0xff] %v672_v12  ;;  %v675_v47 = vadd.f32 %v1402_v33, %v674_v17  ;;  %v922_v18 = vpop.f32.mrb[35].mxu1 }
 0x282   :  { %720 = vst [vmem:[#allocation2 + $0x98] sm:$0xff] %v675_v47 }
 0x285   :  { %v679_v25 = vpop.f32.mrb[36].mxu1 }
 0x286   :  { %v680_v23 = vadd.f32 %v1402_v33, %v679_v25  ;;  %v925_v27 = vpop.f32.mrb[37].mxu1 }
 0x287   :  { %v682_v49 = vpop.f32.mrb[38].mxu1 }
 0x288   :  { %721 = vst [vmem:[#allocation2 + $0xa0] sm:$0xff] %v680_v23  ;;  %v683_v50 = vadd.f32 %v1402_v33, %v682_v49  ;;  %v926_v52 = vpop.f32.mrb[39].mxu1 }
 0x28a   :  { %722 = vst [vmem:[#allocation2 + $0xa8] sm:$0xff] %v683_v50 }
 0x28d   :  { %v687_v53 = vpop.f32.mrb[40].mxu1 }
 0x28e   :  { %v688_v54 = vadd.f32 %v1402_v33, %v687_v53  ;;  %v929_v57 = vpop.f32.mrb[41].mxu1 }
 0x28f   :  { %v690_v58 = vpop.f32.mrb[42].mxu1 }
 0x290   :  { %723 = vst [vmem:[#allocation2 + $0xb0] sm:$0xff] %v688_v54  ;;  %v691_v59 = vadd.f32 %v1402_v33, %v690_v58  ;;  %v930_v1 = vpop.f32.mrb[43].mxu1 }
 0x292   :  { %724 = vst [vmem:[#allocation2 + $0xb8] sm:$0xff] %v691_v59 }
 0x295   :  { %v695_v62 = vpop.f32.mrb[44].mxu1 }
 0x296   :  { %v696_v63 = vadd.f32 %v1402_v33, %v695_v62  ;;  %v933_v0 = vpop.f32.mrb[45].mxu1 }
 0x297   :  { %v698_v3 = vpop.f32.mrb[46].mxu1 }
 0x298   :  { %725 = vst [vmem:[#allocation2 + $0xc0] sm:$0xff] %v696_v63  ;;  %v934_v4 = vpop.f32.mrb[47].mxu1 }
 0x299   :  { %991 = shalt.err (!%p988_p4)
}
 0x29a   :  { %s992_s21 = scalar_lea.hbm %s1447_s6, 3200 }
 0x29b   :  { %p993_p5 = scmp.ne.s32.totalorder %s1447_s6, %s992_s21  ;;  %p996_p6 = scmp.lt.u32.totalorder %s992_s21, %s1447_s6 }
 0x29d   :  { %p998_p7 = pnand %p996_p6, %p993_p5 }
 0x29f   :  { %1001 = shalt.err (!%p998_p7)
}
 0x2a0   :  { %s1007_s25 = smov 128   ;;  %s1008_s26 = smov 8  }
 0x2a1   :  { %737 = dma.vmem_to_hbm [thread:$0]  %s732_s17, 3200, %s1447_s6, [#allocation3], %s1007_s25, %s1007_s25, %s1008_s26  }
 0x2a2   :  { %1002 = dma.done.wait [#allocation3], 3200  }
 0x2a3   :  { %1003 = vsyncadd [#allocation3], 4294964096 }
 0x2a4   :  { %741 = vsyncpa [#allocation3], 1 }

</bundles_post_ra>
